<compile_context>
chip_gen: v6e
topology: v6e:2x2x1
jax: 0.10.0
libtpu: 0.0.40
codegen_flags: <defaults>
</compile_context>

<pallas_src>
import functools

import jax
import jax.numpy as jnp
import numpy as np
from jax import lax
from jax.experimental import pallas as pl
from jax.experimental.pallas import tpu as pltpu


def _conv_chunk(x_ref, w, c0, cs, *, ksize, stride, dilation, fuse_taps):
    """Temporal conv for `cs` output rows starting at (possibly traced) row c0.

    x_ref: (1, T_pad, V, C_in) VMEM ref (one padded sample, channels-last).
    w:     already-loaded weights: (K*C_in, Ct) if fuse_taps else (K, C_in, Ct).
    Returns (1, cs, V, Ct) float32.
    """
    def tap(k):
        start = c0 * stride + k * dilation
        if stride == 1:
            return x_ref[:, pl.ds(start, cs), :, :]
        return x_ref[:, pl.ds(start, cs, stride=stride), :, :]

    if fuse_taps:
        lhs = tap(0) if ksize == 1 else jnp.concatenate(
            [tap(k) for k in range(ksize)], axis=-1)          # (1, cs, V, K*C_in)
        return lax.dot_general(lhs, w, (((3,), (0,)), ((), ())),
                               preferred_element_type=jnp.float32)
    y = None
    for k in range(ksize):                                    # per-tap accumulated dots
        yk = lax.dot_general(tap(k), w[k], (((3,), (0,)), ((), ())),
                             preferred_element_type=jnp.float32)
        y = yk if y is None else y + yk
    return y


def _conv_stats_kernel(x_ref, w_ref, stats_ref, *, ksize, stride, dilation,
                       t_out, t_chunk, fuse_taps):
    """Phase 1: per-(sample, channel-tile) partial conv statistics.

    stats_ref: (1, 8, Ct); row 0 = sum(y), row 1 = sum(y*y), rows 2..7 = 0.
    """
    v = x_ref.shape[2]
    ct = stats_ref.shape[-1]
    w = w_ref[...]
    n_full = t_out // t_chunk
    tail = t_out - n_full * t_chunk

    def accum(c0, cs, s1, s2):
        y = _conv_chunk(x_ref, w, c0, cs, ksize=ksize, stride=stride,
                        dilation=dilation, fuse_taps=fuse_taps)
        y2 = y.reshape(cs * v, ct)
        s1 = s1 + jnp.sum(y2, axis=0, keepdims=True)
        s2 = s2 + jnp.sum(y2 * y2, axis=0, keepdims=True)
        return s1, s2

    def body(idx, carry):
        return accum(idx * t_chunk, t_chunk, *carry)

    init = (jnp.zeros((1, ct), jnp.float32), jnp.zeros((1, ct), jnp.float32))
    s1, s2 = lax.fori_loop(0, n_full, body, init, unroll=n_full <= 4)
    if tail:
        s1, s2 = accum(n_full * t_chunk, tail, s1, s2)
    stats_ref[...] = jnp.concatenate(
        [s1, s2, jnp.zeros((6, ct), jnp.float32)], axis=0).reshape(1, 8, ct)


def _conv_bn_kernel(x_ref, w_ref, scale_ref, shift_ref, o_ref, *, ksize, stride,
                    dilation, t_out, t_chunk, fuse_taps):
    """Phase 2: recompute the conv and apply folded BN scale/shift."""
    w = w_ref[...]
    scale = scale_ref[...]                                    # (1, Ct) f32
    shift = shift_ref[...]
    n_full = t_out // t_chunk
    tail = t_out - n_full * t_chunk

    def emit(c0, cs):
        y = _conv_chunk(x_ref, w, c0, cs, ksize=ksize, stride=stride,
                        dilation=dilation, fuse_taps=fuse_taps)  # (1, cs, V, Ct)
        o_ref[:, pl.ds(c0, cs), :, :] = (y * scale + shift).astype(o_ref.dtype)

    def body(idx, carry):
        emit(idx * t_chunk, t_chunk)
        return carry

    lax.fori_loop(0, n_full, body, 0, unroll=n_full <= 4)
    if tail:
        emit(n_full * t_chunk, tail)


def _device_kind():
    try:
        return jax.devices()[0].device_kind.lower()
    except Exception:
        return ""


def temporal_conv_bn(x_nchw, w_oik1, bias, gamma, beta, *,
                     stride=1, dilation=1, eps=1e-5):
    """x_nchw: (N, C_in, T, V); w_oik1: (C_out, C_in, K, 1) (torch Conv2d layout).

    `bias` is accepted for API parity but never enters the kernels: with
    training-mode BN, (y + b) - mean(y + b) == y - mean(y), so it cancels.
    """
    del bias
    n, c_in, t, v = x_nchw.shape
    c_out, _, ksize, _ = w_oik1.shape

    pad = (ksize + (ksize - 1) * (dilation - 1) - 1) // 2
    eff_k = (ksize - 1) * dilation + 1
    t_pad = t + 2 * pad
    t_out = (t_pad - eff_k) // stride + 1

    kind = _device_kind()
    # Channel tile: 256 on v6e (256-wide MXU, halves input re-reads) when there
    # are enough output channels; otherwise 128.
    ct = 256 if ("v6" in kind and c_out > 128) else 128
    c_out_pad = -(-c_out // ct) * ct
    grid_j = c_out_pad // ct
    # VMEM limit per generation: v5e/v6e have 128 MiB physical, v7x only 64 MiB.
    if "v5" in kind or "v6" in kind:
        vmem_limit = 96 * 1024 * 1024
    else:
        vmem_limit = 48 * 1024 * 1024

    # Channels-last so channels ride the lane axis; pad time for 'same' conv.
    x_cl = jnp.transpose(x_nchw, (0, 2, 3, 1))                  # (N, T, V, C_in)
    x_cl = jnp.pad(x_cl, ((0, 0), (pad, pad), (0, 0), (0, 0)))  # (N, T_pad, V, C_in)

    # Fused lane-axis im2col only when C_in is lane aligned; otherwise keep the
    # weights split per tap for accumulated depth-C_in dots.
    fuse_taps = (ksize == 1) or (c_in % 128 == 0)
    w_kio = jnp.transpose(w_oik1[..., 0], (2, 1, 0))            # (K, C_in, C_out)
    w_kio = jnp.pad(w_kio, ((0, 0), (0, 0), (0, c_out_pad - c_out)))
    w_kio = w_kio.astype(x_cl.dtype)
    if fuse_taps:
        w_arg = w_kio.reshape(ksize * c_in, c_out_pad)
        w_spec = pl.BlockSpec((ksize * c_in, ct), lambda j, i: (0, j))
    else:
        w_arg = w_kio
        w_spec = pl.BlockSpec((ksize, c_in, ct), lambda j, i: (0, 0, j))

    t_chunk = min(t_out, 128)
    common = dict(ksize=ksize, stride=stride, dilation=dilation,
                  t_out=t_out, t_chunk=t_chunk, fuse_taps=fuse_taps)
    x_spec = pl.BlockSpec((1, t_pad, v, c_in), lambda j, i: (i, 0, 0, 0))

    # ---- phase 1: partial per-(sample, channel-tile) sum / sumsq --------------
    stats = pl.pallas_call(
        functools.partial(_conv_stats_kernel, **common),
        out_shape=jax.ShapeDtypeStruct((n, 8, c_out_pad), jnp.float32),
        grid=(grid_j, n),
        in_specs=[x_spec, w_spec],
        out_specs=pl.BlockSpec((1, 8, ct), lambda j, i: (i, 0, j)),
        compiler_params=pltpu.CompilerParams(
            dimension_semantics=("parallel", "parallel"),
            vmem_limit_bytes=vmem_limit),
    )(x_cl, w_arg)

    # Finalize batch statistics (tiny arrays) and fold gamma/beta into a single
    # per-channel scale / shift.
    count = n * t_out * v
    ssum = stats[:, 0, :].sum(axis=0)
    ssq = stats[:, 1, :].sum(axis=0)
    mean = ssum / count
    var = jnp.maximum(ssq / count - mean * mean, 0.0)
    g_p = jnp.pad(gamma.astype(jnp.float32), (0, c_out_pad - c_out))
    b_p = jnp.pad(beta.astype(jnp.float32), (0, c_out_pad - c_out))
    inv_std = lax.rsqrt(var + eps)
    scale = (g_p * inv_std).reshape(1, c_out_pad)
    shift = (b_p - mean * g_p * inv_std).reshape(1, c_out_pad)

    # ---- phase 2: recompute conv, apply BN, write the final output once ------
    out_cl = pl.pallas_call(
        functools.partial(_conv_bn_kernel, **common),
        out_shape=jax.ShapeDtypeStruct((n, t_out, v, c_out_pad), x_nchw.dtype),
        grid=(grid_j, n),
        in_specs=[
            x_spec,
            w_spec,
            pl.BlockSpec((1, ct), lambda j, i: (0, j)),
            pl.BlockSpec((1, ct), lambda j, i: (0, j)),
        ],
        out_specs=pl.BlockSpec((1, t_out, v, ct), lambda j, i: (i, 0, 0, j)),
        compiler_params=pltpu.CompilerParams(
            dimension_semantics=("parallel", "parallel"),
            vmem_limit_bytes=vmem_limit),
    )(x_cl, w_arg, scale, shift)

    # TODO(synk): keep channels-last end-to-end if the consumer allows it; the
    #             channel-pad slice and NCHW transpose are extra HBM passes.
    out_cl = out_cl[:, :, :, :c_out]
    return jnp.transpose(out_cl, (0, 3, 1, 2))                  # back to NCHW


def _reference(x_nchw, w_oik1, bias, gamma, beta, *, stride, dilation, eps):
    ksize = w_oik1.shape[2]
    pad = (ksize + (ksize - 1) * (dilation - 1) - 1) // 2
    y = lax.conv_general_dilated(
        x_nchw, w_oik1,
        window_strides=(stride, 1),
        padding=((pad, pad), (0, 0)),
        rhs_dilation=(dilation, 1),
        dimension_numbers=("NCHW", "OIHW", "NCHW"),
    )
    y = y + bias[None, :, None, None]
    mean = y.mean(axis=(0, 2, 3), keepdims=True)
    var = ((y - mean) ** 2).mean(axis=(0, 2, 3), keepdims=True)
    return (y - mean) / jnp.sqrt(var + eps) * gamma[None, :, None, None] \
        + beta[None, :, None, None]


if __name__ == "__main__":
    # Small shapes consistent with the module: (batch, channels, time, joints).
    N, C_IN, C_OUT, T, V = 2, 4, 8, 16, 16
    K, STRIDE, DILATION = 3, 1, 1

    key = jax.random.PRNGKey(0)
    kx, kw, kb = jax.random.split(key, 3)

    x = jax.random.normal(kx, (N, C_IN, T, V), dtype=jnp.float32)
    # Conv2d parameters (deterministic); BN affine uses torch defaults (1, 0).
    w = 0.1 * jax.random.normal(kw, (C_OUT, C_IN, K, 1), dtype=jnp.float32)
    b = 0.1 * jax.random.normal(kb, (C_OUT,), dtype=jnp.float32)
    gamma = jnp.ones((C_OUT,), dtype=jnp.float32)
    beta = jnp.zeros((C_OUT,), dtype=jnp.float32)

    out = temporal_conv_bn(x, w, b, gamma, beta,
                           stride=STRIDE, dilation=DILATION, eps=1e-5)
    out = jax.block_until_ready(out)

    ref = _reference(x, w, b, gamma, beta,
                     stride=STRIDE, dilation=DILATION, eps=1e-5)
    ref = jax.block_until_ready(ref)

    np.testing.assert_allclose(np.asarray(out), np.asarray(ref),
                               rtol=1e-3, atol=1e-3)
    print("KERNEL_OK")
</pallas_src>

<mosaic_0001>
module attributes {stable_mosaic.version = 11 : i64} {
  func.func @_conv_stats_kernel(%arg0: i32, %arg1: i32, %arg2: memref<1x18x16x4xf32, #tpu.memory_space<vmem>>, %arg3: memref<3x4x128xf32, #tpu.memory_space<vmem>>, %arg4: memref<1x8x128xf32, #tpu.memory_space<vmem>>) attributes {dimension_semantics = [#tpu.dimension_semantics<parallel>, #tpu.dimension_semantics<parallel>], iteration_bounds = array<i64: 1, 2>, scalar_prefetch = 0 : i64, scratch_operands = 0 : i64, tpu.core_type = #tpu.core_type<tc>, window_params = [{transform_indices = @transform_0, window_bounds = array<i64: 1, 18, 16, 4>}, {transform_indices = @transform_1, window_bounds = array<i64: 3, 4, 128>}, {transform_indices = @transform_2, window_bounds = array<i64: 1, 8, 128>}]} {
    %c0 = arith.constant 0 : index
    %c0_0 = arith.constant 0 : index
    %c0_1 = arith.constant 0 : index
    %0 = vector.load %arg3[%c0, %c0_0, %c0_1] : memref<3x4x128xf32, #tpu.memory_space<vmem>>, vector<3x4x128xf32>
    %cst = arith.constant 0.000000e+00 : f32
    %1 = vector.broadcast %cst : f32 to vector<1x128xf32>
    %cst_2 = arith.constant 0.000000e+00 : f32
    %2 = vector.broadcast %cst_2 : f32 to vector<1x128xf32>
    %c0_i32 = arith.constant 0 : i32
    %c16_i32 = arith.constant 16 : i32
    %3 = arith.muli %c0_i32, %c16_i32 : i32
    %c1_i32 = arith.constant 1 : i32
    %4 = arith.muli %3, %c1_i32 : i32
    %c0_i32_3 = arith.constant 0 : i32
    %5 = arith.addi %4, %c0_i32_3 : i32
    %c0_4 = arith.constant 0 : index
    %6 = arith.index_cast %5 : i32 to index
    %c0_5 = arith.constant 0 : index
    %c0_6 = arith.constant 0 : index
    %7 = vector.load %arg2[%c0_4, %6, %c0_5, %c0_6] : memref<1x18x16x4xf32, #tpu.memory_space<vmem>>, vector<1x16x16x4xf32>
    %8 = vector.extract_strided_slice %0 {offsets = [0, 0, 0], sizes = [1, 4, 128], strides = [1, 1, 1]} : vector<3x4x128xf32> to vector<1x4x128xf32>
    %9 = vector.shape_cast %8 : vector<1x4x128xf32> to vector<4x128xf32>
    %cst_7 = arith.constant dense<0.000000e+00> : vector<1x16x16x128xf32>
    %10 = tpu.matmul %7, %9, %cst_7 {dimension_numbers = #tpu.dot_dimension_numbers<[3], [0], [0, 1, 2], [1], [0, 0, 0, 1, 0, 2, 1, 1], [], []>} : vector<1x16x16x4xf32>, vector<4x128xf32>, vector<1x16x16x128xf32> -> vector<1x16x16x128xf32>
    %c1_i32_8 = arith.constant 1 : i32
    %11 = arith.muli %3, %c1_i32_8 : i32
    %c1_i32_9 = arith.constant 1 : i32
    %12 = arith.addi %11, %c1_i32_9 : i32
    %c0_10 = arith.constant 0 : index
    %13 = arith.index_cast %12 : i32 to index
    %c0_11 = arith.constant 0 : index
    %c0_12 = arith.constant 0 : index
    %14 = vector.load %arg2[%c0_10, %13, %c0_11, %c0_12] : memref<1x18x16x4xf32, #tpu.memory_space<vmem>>, vector<1x16x16x4xf32>
    %15 = vector.extract_strided_slice %0 {offsets = [1, 0, 0], sizes = [1, 4, 128], strides = [1, 1, 1]} : vector<3x4x128xf32> to vector<1x4x128xf32>
    %16 = vector.shape_cast %15 : vector<1x4x128xf32> to vector<4x128xf32>
    %cst_13 = arith.constant dense<0.000000e+00> : vector<1x16x16x128xf32>
    %17 = tpu.matmul %14, %16, %cst_13 {dimension_numbers = #tpu.dot_dimension_numbers<[3], [0], [0, 1, 2], [1], [0, 0, 0, 1, 0, 2, 1, 1], [], []>} : vector<1x16x16x4xf32>, vector<4x128xf32>, vector<1x16x16x128xf32> -> vector<1x16x16x128xf32>
    %18 = arith.addf %10, %17 : vector<1x16x16x128xf32>
    %c1_i32_14 = arith.constant 1 : i32
    %19 = arith.muli %3, %c1_i32_14 : i32
    %c2_i32 = arith.constant 2 : i32
    %20 = arith.addi %19, %c2_i32 : i32
    %c0_15 = arith.constant 0 : index
    %21 = arith.index_cast %20 : i32 to index
    %c0_16 = arith.constant 0 : index
    %c0_17 = arith.constant 0 : index
    %22 = vector.load %arg2[%c0_15, %21, %c0_16, %c0_17] : memref<1x18x16x4xf32, #tpu.memory_space<vmem>>, vector<1x16x16x4xf32>
    %23 = vector.extract_strided_slice %0 {offsets = [2, 0, 0], sizes = [1, 4, 128], strides = [1, 1, 1]} : vector<3x4x128xf32> to vector<1x4x128xf32>
    %24 = vector.shape_cast %23 : vector<1x4x128xf32> to vector<4x128xf32>
    %cst_18 = arith.constant dense<0.000000e+00> : vector<1x16x16x128xf32>
    %25 = tpu.matmul %22, %24, %cst_18 {dimension_numbers = #tpu.dot_dimension_numbers<[3], [0], [0, 1, 2], [1], [0, 0, 0, 1, 0, 2, 1, 1], [], []>} : vector<1x16x16x4xf32>, vector<4x128xf32>, vector<1x16x16x128xf32> -> vector<1x16x16x128xf32>
    %26 = arith.addf %18, %25 : vector<1x16x16x128xf32>
    %27 = vector.shape_cast %26 : vector<1x16x16x128xf32> to vector<256x128xf32>
    %cst_19 = arith.constant dense<0.000000e+00> : vector<128xf32>
    %28 = vector.multi_reduction <add>, %27, %cst_19 [0] : vector<256x128xf32> to vector<128xf32>
    %29 = vector.shape_cast %28 : vector<128xf32> to vector<1x128xf32>
    %30 = arith.addf %1, %29 : vector<1x128xf32>
    %31 = arith.mulf %27, %27 : vector<256x128xf32>
    %cst_20 = arith.constant dense<0.000000e+00> : vector<128xf32>
    %32 = vector.multi_reduction <add>, %31, %cst_20 [0] : vector<256x128xf32> to vector<128xf32>
    %33 = vector.shape_cast %32 : vector<128xf32> to vector<1x128xf32>
    %34 = arith.addf %2, %33 : vector<1x128xf32>
    %c1_i32_21 = arith.constant 1 : i32
    %cst_22 = arith.constant 0.000000e+00 : f32
    %35 = vector.broadcast %cst_22 : f32 to vector<6x128xf32>
    %36 = tpu.concatenate %30, %34, %35 in 0 : vector<1x128xf32>, vector<1x128xf32>, vector<6x128xf32> -> vector<8x128xf32>
    %37 = vector.shape_cast %36 : vector<8x128xf32> to vector<1x8x128xf32>
    %c0_23 = arith.constant 0 : index
    %c0_24 = arith.constant 0 : index
    %c0_25 = arith.constant 0 : index
    %38 = vector.load %arg4[%c0_23, %c0_24, %c0_25] : memref<1x8x128xf32, #tpu.memory_space<vmem>>, vector<1x8x128xf32>
    tpu.vector_store %arg4[%c0_23, %c0_24, %c0_25], %37 {strides = array<i32>} : memref<1x8x128xf32, #tpu.memory_space<vmem>>, vector<1x8x128xf32>,
    return
  }
  func.func @transform_0(%arg0: i32, %arg1: i32) -> (i32, i32, i32, i32) {
    %c0_i32 = arith.constant 0 : i32
    %c0_i32_0 = arith.constant 0 : i32
    %c0_i32_1 = arith.constant 0 : i32
    %c0_i32_2 = arith.constant 0 : i32
    return %arg1, %c0_i32, %c0_i32_0, %c0_i32_1 : i32, i32, i32, i32
  }
  func.func @transform_1(%arg0: i32, %arg1: i32) -> (i32, i32, i32) {
    %c0_i32 = arith.constant 0 : i32
    %c0_i32_0 = arith.constant 0 : i32
    %c0_i32_1 = arith.constant 0 : i32
    return %c0_i32, %c0_i32_0, %arg0 : i32, i32, i32
  }
  func.func @transform_2(%arg0: i32, %arg1: i32) -> (i32, i32, i32) {
    %c0_i32 = arith.constant 0 : i32
    %c0_i32_0 = arith.constant 0 : i32
    return %arg1, %c0_i32, %arg0 : i32, i32, i32
  }
}

</mosaic_0001>

<bundles_post_ra>
// kernel: tpu_custom_call.1
= control target key start
LH: loop header
LB: loop body
LE: loop exit
PB: predicated region body
PF: predicated region fallthrough
CT: control target
= control target key end

     0   :  { %7 = vsyncpa [#allocation3], 0  ;;  %s2496_s0 = inlined_call_operand.vmem [shape: f32[2,18,16,4], index: 0, kind: input, shape index: {}]   ;;  %s2497_s1 = inlined_call_operand.vmem [shape: f32[3,4,128], index: 1, kind: input, shape index: {}]   ;;  %s2498_s2 = inlined_call_operand.hbm [shape: f32[2,8,128], index: 2, kind: output, shape index: {}]  }
   0x1   :  { %9 = vsyncpa [#allocation3 + $0x1], 0  ;;  %s2067_s9 = smov 0   ;;  %s2069_s10 = smov 0  }
   0x2   :  { %s2071_s11 = smov 0   ;;  %s2073_s12 = smov 0  }
   0x3   :  { %s2075_s13 = smov 0   ;;  %s2077_s14 = smov 0  }
   0x4 LB: > { %s1491_s15 = sadd.s32 4294967295, %s2049_s14   ;;  %s1492_s16 = sadd.s32 4294967294, %s2049_s14   ;;  %s2049_s14 = sphi %s2077_s14, %s15_s14   ;;  %s2045_s13 = sphi %s2075_s13, %s2505_s13   ;;  %s2041_s12 = sphi %s2073_s12, %s2504_s12   ;;  %s2037_s11 = sphi %s2071_s11, %s2503_s11   ;;  %s2033_s10 = sphi %s2069_s10, %s2502_s10   ;;  %s2029_s9 = sphi %s2067_s9, %s2501_s9  }
   0x5   : > { %s24_s17 = sadd.s32 1, %s2045_s13  ;;  %s88_s18 = sadd.s32 1, %s2037_s11 }
   0x6   : > { %p25_p0 = scmp.ge.s32.totalorder %s24_s17, 2  ;;  %p98_p1 = scmp.ne.s32.totalorder %s2037_s11, %s2033_s10 }
   0x7   : > { %p99_p2 = scmp.eq.s32.totalorder %s1491_s15, 1  ;;  %p104_p3 = scmp.ne.s32.totalorder %s2033_s10, %s2029_s9 }
   0x8   : > { %s2507_s17 = smov (%p25_p0, %s24_s17), 0  ;;  %p105_p5 = scmp.eq.s32.totalorder %s1492_s16, 1 }
   0x9   : > { %p2107_p4 = por %p99_p2, %p98_p1  ;;  %s83_s20 = ssub.s32 %s2045_s13, %s2507_s17 }
   0xa   : > { %p1496_p6 = scmp.ge.s32.totalorder %s2049_s14, 1  ;;  %p86_p7 = scmp.eq.s32.totalorder %s83_s20, 0 }
   0xb   : > { %p2114_p8 = por %p105_p5, %p104_p3  ;;  %p138_p9 = scmp.lt.s32.totalorder %s2049_s14, 3 }
   0xc   : > { %s2120_s22 = scalar_select %p86_p7, %s2037_s11, %s88_s18  }
   0xd   : > { %p139_p10 = pnand %p1496_p6, %p138_p9 }
   0xe   : > { %p164_p11 = scmp.lt.s32.totalorder (!%p139_p10), %s2041_s12, 1  ;;  %s161_s6 = sand.u32 (!%p139_p10), 1, %s2033_s10  }
   0xf   : > { %142 = sbr.rel (%p139_p10) target bundleno = 352 (0x160), region = 28  ;;  %s1497_s7 = sshll.u32 (!%p139_p10), %s161_s6, 3 }
  0x10   : > { %s1663_s8 = sshll.u32 (!%p139_p10), %s2041_s12, 7  ;;  %s163_s15 = scalar_lea.vmem (!%p139_p10), [#allocation2], %s1497_s7 }
  0x11   : > { %s1408_s16 = sshll.u32 (!%p139_p10), %s163_s15, 4  ;;  %s2456_s23 = scalar_lea.hbm (!%p139_p10), %s2498_s2, %s1663_s8  ;;  %s1409_s16 = int_to_ptr.vmem [resolvable:$true] %s1408_s16 }
  0x12   : > { %s1394_s24 = scalar_lea.sflag (!%p139_p10), [#allocation3], %s161_s6  ;;  %s1973_s25 = scalar_lea.vmem (!%p139_p10), %s1409_s16, 128 }
  0x13   : > { %p1974_p12 = scmp.ne.s32.totalorder (!%p139_p10), %s1409_s16, %s1973_s25 }
  0x14   : > { %v174_v0 = vld [vmem:[%s2497_s1 + $0x4] sm:$0xf]  ;;  %vm338_vm0 = vcmask 1043456   ;;  %v173_v1 = vld [vmem:[%s2497_s1] sm:$0xf]  ;;  %s165_s29 = scalar_select %p164_p11, %s2041_s12, 1 }
  0x15   : > { %1915 = vmatprep.subr.msk.mxu1 %vm338_vm0, %v174_v0  ;;  %1765 = vmatprep.subr.msk.mxu0 %vm338_vm0, %v174_v0  ;;  %v175_v2 = vld [vmem:[%s2497_s1 + $0x8] sm:$0xf]  ;;  %vm241_vm1 = vcmask 31744   ;;  %vm1388_vm2 = vcmask 1040384   ;;  %vm1390_vm3 = vcmask 1041408   ;;  %p1975_p13 = pnand %p1974_p12, %p2107_p4  ;;  %s2051_s12 = smov [#allocation2]  }
  0x16   : > { %1916 = vmatpush3.msk.msra.mxu1 %vm338_vm0, %v174_v0  ;;  %1766 = vmatpush3.msk.msra.mxu0 %vm338_vm0, %v174_v0  ;;  %s1917_s30 = smul.u32 288, %s165_s29  ;;  %s1977_s26 = sshll.u32 %s2051_s12, 4  ;;  %s1978_s26 = int_to_ptr.vmem [resolvable:$false] %s1977_s26 }
  0x17   : > { %1815 = vmatprep.subr.msk.mxu1 %vm338_vm0, %v173_v1  ;;  %1865 = vmatprep.subr.msk.mxu0 %vm338_vm0, %v175_v2  ;;  %p1976_p0 = pneg %p1975_p13  ;;  %s1979_s27 = scalar_lea.vmem %s1978_s26, 256 }
  0x18   : > { %s2142_s5 = scalar_lea.vmem %s2496_s0, %s1917_s30  ;;  %p1980_p1 = scmp.lt.s32.totalorder %s1409_s16, %s1978_s26 }
  0x19   : > { %v2145_v3 = vld [vmem:[%s2142_s5 + $0x10] sm:$0xff]  ;;  %v2151_v5 = vld [vmem:[%s2142_s5 + $0x18] sm:$0xff]  ;;  %v2161_v7 = vld [vmem:[%s2142_s5 + $0x20] sm:$0xff]  ;;  %p1981_p2 = scmp.lt.s32.totalorder %s1979_s27, %s1973_s25 }
  0x1a   : > { %v2148_v4 = vld [vmem:[%s2142_s5 + $0x90] sm:$0xff]  ;;  %1767 = vmatprep.mubr.msk.f32.mxu0 %vm241_vm1, %v2145_v3  ;;  %v2158_v6 = vld [vmem:[%s2142_s5 + $0x98] sm:$0xff]  ;;  %v2164_v8 = vld [vmem:[%s2142_s5 + $0xa0] sm:$0xff] }
  0x1b   : > { %1791 = vmatprep.mubr.msk.f32.mxu1 %vm241_vm1, %v2148_v4  ;;  %1768 = vmatmul.mubr.msk.f32.vlgmr.msra.gmra.mxu0 %vm241_vm1, %v2151_v5  ;;  %v2173_v9 = vld [vmem:[%s2142_s5 + $0x28] sm:$0xff]  ;;  %v2183_v11 = vld [vmem:[%s2142_s5 + $0x30] sm:$0xff]  ;;  %v1504_v13 = vld [vmem:[%s2142_s5 + $0x38] sm:$0xff]  ;;  %p1982_p3 = por %p1981_p2, %p1980_p1 }
  0x1c   : > { %1792 = vmatmul.mubr.msk.f32.vlgmr.msra.gmra.mxu1 %vm241_vm1, %v2158_v6  ;;  %1866 = vmatpush3.msk.msra.mxu0 %vm338_vm0, %v175_v2  ;;  %v2176_v10 = vld [vmem:[%s2142_s5 + $0xa8] sm:$0xff]  ;;  %v2186_v12 = vld [vmem:[%s2142_s5 + $0xb0] sm:$0xff]  ;;  %v2198_v14 = vld [vmem:[%s2142_s5 + $0xb8] sm:$0xff] }
  0x1d   : > { %1816 = vmatpush3.msk.msra.mxu1 %vm338_vm0, %v173_v1  ;;  %1770 = vmatprep.mubr.msk.f32.mxu0 %vm241_vm1, %v2161_v7  ;;  %v1505_v15 = vld [vmem:[%s2142_s5 + $0x40] sm:$0xff]  ;;  %v1506_v17 = vld [vmem:[%s2142_s5 + $0x48] sm:$0xff]  ;;  %v1507_v19 = vld [vmem:[%s2142_s5 + $0x50] sm:$0xff]  ;;  %p1983_p5 = pnand %p1982_p3, %p1976_p0 }
  0x1e   : > { %1794 = vmatprep.mubr.msk.f32.mxu1 %vm241_vm1, %v2164_v8  ;;  %v2202_v16 = vld [vmem:[%s2142_s5 + $0xc0] sm:$0xff]  ;;  %v2212_v18 = vld [vmem:[%s2142_s5 + $0xc8] sm:$0xff]  ;;  %v2216_v20 = vld [vmem:[%s2142_s5 + $0xd0] sm:$0xff] }
  0x1f   : > { %1771 = vmatmul.mubr.msk.f32.gmra.mxu0 %vm241_vm1, %v2173_v9  ;;  %v1508_v21 = vld [vmem:[%s2142_s5 + $0x58] sm:$0xff]  ;;  %v1509_v23 = vld [vmem:[%s2142_s5 + $0x60] sm:$0xff]  ;;  %v1510_v25 = vld [vmem:[%s2142_s5 + $0x68] sm:$0xff] }
  0x20   : > { %1795 = vmatmul.mubr.msk.f32.gmra.mxu1 %vm241_vm1, %v2176_v10  ;;  %1773 = vmatprep.mubr.msk.f32.mxu0 %vm241_vm1, %v2183_v11  ;;  %v2226_v22 = vld [vmem:[%s2142_s5 + $0xd8] sm:$0xff]  ;;  %v2230_v24 = vld [vmem:[%s2142_s5 + $0xe0] sm:$0xff]  ;;  %v2240_v26 = vld [vmem:[%s2142_s5 + $0xe8] sm:$0xff] }
  0x21   : > { %1797 = vmatprep.mubr.msk.f32.mxu1 %vm241_vm1, %v2186_v12  ;;  %v1511_v27 = vld [vmem:[%s2142_s5 + $0x70] sm:$0xff]  ;;  %v1512_v29 = vld [vmem:[%s2142_s5 + $0x78] sm:$0xff]  ;;  %v1513_v31 = vld [vmem:[%s2142_s5 + $0x80] sm:$0xff] }
  0x22   : > { %v2244_v28 = vld [vmem:[%s2142_s5 + $0xf0] sm:$0xff]  ;;  %v2254_v30 = vld [vmem:[%s2142_s5 + $0xf8] sm:$0xff]  ;;  %v2258_v32 = vld [vmem:[%s2142_s5 + $0x100] sm:$0xff] }
  0x23   : > { %1774 = vmatmul.mubr.msk.f32.gmra.mxu0 %vm241_vm1, %v1504_v13  ;;  %v1514_v33 = vld [vmem:[%s2142_s5 + $0x88] sm:$0xff]  ;;  %v176_v35 = vld [vmem:[%s2142_s5] sm:$0xff]  ;;  %v1627_v37 = vld [vmem:[%s2142_s5 + $0x110] sm:$0xff] }
  0x24   : > { %1798 = vmatmul.mubr.msk.f32.gmra.mxu1 %vm241_vm1, %v2198_v14  ;;  %1776 = vmatprep.mubr.msk.f32.mxu0 %vm241_vm1, %v1505_v15  ;;  %v2268_v34 = vld [vmem:[%s2142_s5 + $0x108] sm:$0xff]  ;;  %v1628_v38 = vld [vmem:[%s2142_s5 + $0x118] sm:$0xff] }
  0x25   : > { %1800 = vmatprep.mubr.msk.f32.mxu1 %vm241_vm1, %v2202_v16  ;;  %v177_v36 = vld [vmem:[%s2142_s5 + $0x8] sm:$0xff] }
  0x27   : > { %1777 = vmatmul.mubr.msk.f32.gmra.mxu0 %vm241_vm1, %v1506_v17 }
  0x28   : > { %1801 = vmatmul.mubr.msk.f32.gmra.mxu1 %vm241_vm1, %v2212_v18  ;;  %1779 = vmatprep.mubr.msk.f32.mxu0 %vm241_vm1, %v1507_v19 }
  0x29   : > { %1803 = vmatprep.mubr.msk.f32.mxu1 %vm241_vm1, %v2216_v20 }
  0x2b   : > { %1780 = vmatmul.mubr.msk.f32.gmra.mxu0 %vm241_vm1, %v1508_v21 }
  0x2c   : > { %1804 = vmatmul.mubr.msk.f32.gmra.mxu1 %vm241_vm1, %v2226_v22  ;;  %1782 = vmatprep.mubr.msk.f32.mxu0 %vm241_vm1, %v1509_v23 }
  0x2d   : > { %1806 = vmatprep.mubr.msk.f32.mxu1 %vm241_vm1, %v2230_v24 }
  0x2f   : > { %1783 = vmatmul.mubr.msk.f32.gmra.mxu0 %vm241_vm1, %v1510_v25 }
  0x30   : > { %1807 = vmatmul.mubr.msk.f32.gmra.mxu1 %vm241_vm1, %v2240_v26  ;;  %1785 = vmatprep.mubr.msk.f32.mxu0 %vm241_vm1, %v1511_v27 }
  0x31   : > { %1809 = vmatprep.mubr.msk.f32.mxu1 %vm241_vm1, %v2244_v28 }
  0x33   : > { %1786 = vmatmul.mubr.msk.f32.gmra.mxu0 %vm241_vm1, %v1512_v29 }
  0x34   : > { %1810 = vmatmul.mubr.msk.f32.gmra.mxu1 %vm241_vm1, %v2254_v30  ;;  %1788 = vmatprep.mubr.msk.f32.mxu0 %vm241_vm1, %v1513_v31 }
  0x35   : > { %1812 = vmatprep.mubr.msk.f32.mxu1 %vm241_vm1, %v2258_v32 }
  0x37   : > { %1789 = vmatmul.mubr.msk.f32.gmra.mxu0 %vm241_vm1, %v1514_v33 }
  0x38   : > { %1813 = vmatmul.mubr.msk.f32.gmra.mxu1 %vm241_vm1, %v2268_v34  ;;  %1867 = vmatprep.mubr.msk.f32.mxu0 %vm241_vm1, %v2161_v7 }
  0x39   : > { %1817 = vmatprep.mubr.msk.f32.mxu1 %vm241_vm1, %v176_v35 }
  0x3b   : > { %1868 = vmatmul.mubr.msk.f32.vlgmr.msra.gmra.mxu0 %vm241_vm1, %v2173_v9 }
  0x3c   : > { %1818 = vmatmul.mubr.msk.f32.vlgmr.msra.gmra.mxu1 %vm241_vm1, %v177_v36  ;;  %1870 = vmatprep.mubr.msk.f32.mxu0 %vm241_vm1, %v2183_v11 }
  0x3d   : > { %1820 = vmatprep.mubr.msk.f32.mxu1 %vm241_vm1, %v2145_v3 }
  0x3f   : > { %1871 = vmatmul.mubr.msk.f32.gmra.mxu0 %vm241_vm1, %v1504_v13 }
  0x40   : > { %1821 = vmatmul.mubr.msk.f32.gmra.mxu1 %vm241_vm1, %v2151_v5  ;;  %1873 = vmatprep.mubr.msk.f32.mxu0 %vm241_vm1, %v1505_v15 }
  0x41   : > { %1823 = vmatprep.mubr.msk.f32.mxu1 %vm241_vm1, %v2161_v7 }
  0x43   : > { %1874 = vmatmul.mubr.msk.f32.gmra.mxu0 %vm241_vm1, %v1506_v17 }
  0x44   : > { %1824 = vmatmul.mubr.msk.f32.gmra.mxu1 %vm241_vm1, %v2173_v9  ;;  %1876 = vmatprep.mubr.msk.f32.mxu0 %vm241_vm1, %v1507_v19 }
  0x45   : > { %1826 = vmatprep.mubr.msk.f32.mxu1 %vm241_vm1, %v2183_v11 }
  0x47   : > { %1877 = vmatmul.mubr.msk.f32.gmra.mxu0 %vm241_vm1, %v1508_v21 }
  0x48   : > { %1827 = vmatmul.mubr.msk.f32.gmra.mxu1 %vm241_vm1, %v1504_v13  ;;  %1879 = vmatprep.mubr.msk.f32.mxu0 %vm241_vm1, %v1509_v23 }
  0x49   : > { %1829 = vmatprep.mubr.msk.f32.mxu1 %vm241_vm1, %v1505_v15 }
  0x4b   : > { %1880 = vmatmul.mubr.msk.f32.gmra.mxu0 %vm241_vm1, %v1510_v25 }
  0x4c   : > { %1830 = vmatmul.mubr.msk.f32.gmra.mxu1 %vm241_vm1, %v1506_v17  ;;  %1882 = vmatprep.mubr.msk.f32.mxu0 %vm241_vm1, %v1511_v27 }
  0x4d   : > { %1832 = vmatprep.mubr.msk.f32.mxu1 %vm241_vm1, %v1507_v19 }
  0x4f   : > { %1883 = vmatmul.mubr.msk.f32.gmra.mxu0 %vm241_vm1, %v1512_v29 }
  0x50   : > { %1833 = vmatmul.mubr.msk.f32.gmra.mxu1 %vm241_vm1, %v1508_v21  ;;  %1885 = vmatprep.mubr.msk.f32.mxu0 %vm241_vm1, %v1513_v31 }
  0x51   : > { %1835 = vmatprep.mubr.msk.f32.mxu1 %vm241_vm1, %v1509_v23 }
  0x53   : > { %1886 = vmatmul.mubr.msk.f32.gmra.mxu0 %vm241_vm1, %v1514_v33 }
  0x54   : > { %1836 = vmatmul.mubr.msk.f32.gmra.mxu1 %vm241_vm1, %v1510_v25  ;;  %1888 = vmatprep.mubr.msk.f32.mxu0 %vm241_vm1, %v2148_v4 }
  0x55   : > { %1838 = vmatprep.mubr.msk.f32.mxu1 %vm241_vm1, %v1511_v27 }
  0x57   : > { %1889 = vmatmul.mubr.msk.f32.gmra.mxu0 %vm241_vm1, %v2158_v6 }
  0x58   : > { %1839 = vmatmul.mubr.msk.f32.gmra.mxu1 %vm241_vm1, %v1512_v29  ;;  %1891 = vmatprep.mubr.msk.f32.mxu0 %vm241_vm1, %v2164_v8 }
  0x59   : > { %1841 = vmatprep.mubr.msk.f32.mxu1 %vm241_vm1, %v1513_v31 }
  0x5b   : > { %1892 = vmatmul.mubr.msk.f32.gmra.mxu0 %vm241_vm1, %v2176_v10 }
  0x5c   : > { %1842 = vmatmul.mubr.msk.f32.gmra.mxu1 %vm241_vm1, %v1514_v33  ;;  %1894 = vmatprep.mubr.msk.f32.mxu0 %vm241_vm1, %v2186_v12 }
  0x5d   : > { %1844 = vmatprep.mubr.msk.f32.mxu1 %vm241_vm1, %v2148_v4 }
  0x5f   : > { %1895 = vmatmul.mubr.msk.f32.gmra.mxu0 %vm241_vm1, %v2198_v14 }
  0x60   : > { %1845 = vmatmul.mubr.msk.f32.gmra.mxu1 %vm241_vm1, %v2158_v6  ;;  %1897 = vmatprep.mubr.msk.f32.mxu0 %vm241_vm1, %v2202_v16 }
  0x61   : > { %1847 = vmatprep.mubr.msk.f32.mxu1 %vm241_vm1, %v2164_v8 }
  0x63   : > { %1898 = vmatmul.mubr.msk.f32.gmra.mxu0 %vm241_vm1, %v2212_v18 }
  0x64   : > { %1848 = vmatmul.mubr.msk.f32.gmra.mxu1 %vm241_vm1, %v2176_v10  ;;  %1900 = vmatprep.mubr.msk.f32.mxu0 %vm241_vm1, %v2216_v20 }
  0x65   : > { %1850 = vmatprep.mubr.msk.f32.mxu1 %vm241_vm1, %v2186_v12 }
  0x67   : > { %1901 = vmatmul.mubr.msk.f32.gmra.mxu0 %vm241_vm1, %v2226_v22 }
  0x68   : > { %1851 = vmatmul.mubr.msk.f32.gmra.mxu1 %vm241_vm1, %v2198_v14  ;;  %1903 = vmatprep.mubr.msk.f32.mxu0 %vm241_vm1, %v2230_v24 }
  0x69   : > { %1853 = vmatprep.mubr.msk.f32.mxu1 %vm241_vm1, %v2202_v16 }
  0x6b   : > { %1904 = vmatmul.mubr.msk.f32.gmra.mxu0 %vm241_vm1, %v2240_v26 }
  0x6c   : > { %1854 = vmatmul.mubr.msk.f32.gmra.mxu1 %vm241_vm1, %v2212_v18  ;;  %1906 = vmatprep.mubr.msk.f32.mxu0 %vm241_vm1, %v2244_v28 }
  0x6d   : > { %1856 = vmatprep.mubr.msk.f32.mxu1 %vm241_vm1, %v2216_v20 }
  0x6f   : > { %1907 = vmatmul.mubr.msk.f32.gmra.mxu0 %vm241_vm1, %v2254_v30 }
  0x70   : > { %1857 = vmatmul.mubr.msk.f32.gmra.mxu1 %vm241_vm1, %v2226_v22  ;;  %1909 = vmatprep.mubr.msk.f32.mxu0 %vm241_vm1, %v2258_v32 }
  0x71   : > { %1859 = vmatprep.mubr.msk.f32.mxu1 %vm241_vm1, %v2230_v24 }
  0x73   : > { %1910 = vmatmul.mubr.msk.f32.gmra.mxu0 %vm241_vm1, %v2268_v34 }
  0x74   : > { %1860 = vmatmul.mubr.msk.f32.gmra.mxu1 %vm241_vm1, %v2240_v26  ;;  %1912 = vmatprep.mubr.msk.f32.mxu0 %vm241_vm1, %v1627_v37 }
  0x75   : > { %1862 = vmatprep.mubr.msk.f32.mxu1 %vm241_vm1, %v2244_v28 }
  0x77   : > { %1913 = vmatmul.mubr.msk.f32.gmra.mxu0 %vm241_vm1, %v1628_v38 }
  0x78   : > { %1863 = vmatmul.mubr.msk.f32.gmra.mxu1 %vm241_vm1, %v2254_v30 }
  0xdb   : > { %v1769_v39 = vpop.f32.mrf.mxu0 }
  0xdc   : > { %v2379_v40 = vpop.f32.mrf.mxu1 }
  0xdd   : > { %v408_v41 = vpop.f32.mrf.mxu0 }
  0xde   : > { %v2381_v42 = vpop.f32.mrf.mxu1 }
  0xdf   : > { %v1772_v43 = vpop.f32.mrf.mxu0 }
  0xe0   : > { %v2383_v44 = vpop.f32.mrf.mxu1 }
  0xe1   : > { %v418_v45 = vpop.f32.mrf.mxu0 }
  0xe2   : > { %v2385_v46 = vpop.f32.mrf.mxu1 }
  0xe3   : > { %v1775_v47 = vpop.f32.mrf.mxu0 }
  0xe4   : > { %v2387_v48 = vpop.f32.mrf.mxu1 }
  0xe5   : > { %v428_v49 = vpop.f32.mrf.mxu0 }
  0xe6   : > { %v2389_v50 = vpop.f32.mrf.mxu1 }
  0xe7   : > { %v1778_v51 = vpop.f32.mrf.mxu0 }
  0xe8   : > { %v2391_v52 = vpop.f32.mrf.mxu1 }
  0xe9   : > { %v438_v53 = vpop.f32.mrf.mxu0 }
  0xea   : > { %v2393_v54 = vpop.f32.mrf.mxu1 }
  0xeb   : > { %v2395_v55 = vpop.f32.mrf.mxu0 }
  0xec   : > { %v2397_v56 = vpop.f32.mrf.mxu1 }
  0xed   : > { %v2399_v57 = vpop.f32.mrf.mxu0 }
  0xee   : > { %v2401_v58 = vpop.f32.mrf.mxu1 }
  0xef   : > { %v2403_v59 = vpop.f32.mrf.mxu0 }
  0xf0   : > { %v2405_v60 = vpop.f32.mrf.mxu1 }
  0xf1   : > { %v2407_v61 = vpop.f32.mrf.mxu0 }
  0xf2   : > { %v2409_v62 = vpop.f32.mrf.mxu1 }
  0xf3   : > { %v2411_v63 = vpop.f32.mrf.mxu0 }
  0xf4   : > { %v2413_v0 = vpop.f32.mrf.mxu1 }
  0xf5   : > { %v2415_v1 = vpop.f32.mrf.mxu0 }
  0xf6   : > { %v2417_v2 = vpop.f32.mrf.mxu1 }
  0xf7   : > { %v2419_v3 = vpop.f32.mrf.mxu0 }
  0xf8   : > { %v2421_v4 = vpop.f32.mrf.mxu1 }
  0xf9   : > { %v2423_v5 = vpop.f32.mrf.mxu0 }
  0xfa   : > { %v2425_v6 = vpop.f32.mrf.mxu1 }
  0xfb   : > { %v1869_v8 = vpop.f32.mrf.mxu0 }
  0xfc   : > { %v1819_v7 = vpop.f32.mrf.mxu1 }
  0xfd   : > { %v738_v9 = vadd.f32 %v1819_v7, %v1769_v39  ;;  %v1089_v11 = vpop.f32.mrf.mxu0 }
  0xfe   : > { %v732_v10 = vpop.f32.mrf.mxu1 }
  0xff   : > { %v733_v12 = vadd.f32 %v732_v10, %v408_v41  ;;  %v1249_v13 = vadd.f32 %v1869_v8, %v738_v9  ;;  %v1872_v15 = vpop.f32.mrf.mxu0 }
 0x100   : > { %v1822_v14 = vpop.f32.mrf.mxu1 }
 0x101   : > { %v1248_v16 = vadd.f32 %v1089_v11, %v733_v12  ;;  %v748_v17 = vadd.f32 %v1822_v14, %v1772_v43  ;;  %v1099_v19 = vpop.f32.mrf.mxu0  ;;  %v1319_v22 = vmul.f32 %v1249_v13, %v1249_v13 }
 0x102   : > { %v742_v18 = vpop.f32.mrf.mxu1 }
 0x103   : > { %v1318_v20 = vmul.f32 %v1248_v16, %v1248_v16  ;;  %v743_v21 = vadd.f32 %v742_v18, %v418_v45  ;;  %v1875_v24 = vpop.f32.mrf.mxu0  ;;  %v1280_v25 = vadd.f32 %v1249_v13, %v1248_v16  ;;  %v1251_v26 = vadd.f32 %v1872_v15, %v748_v17 }
 0x104   : > { %v1825_v23 = vpop.f32.mrf.mxu1 }
 0x105   : > { %v1250_v27 = vadd.f32 %v1099_v19, %v743_v21  ;;  %v758_v28 = vadd.f32 %v1825_v23, %v1775_v47  ;;  %v1109_v30 = vpop.f32.mrf.mxu0  ;;  %v1350_v31 = vadd.f32 %v1319_v22, %v1318_v20  ;;  %v1321_v38 = vmul.f32 %v1251_v26, %v1251_v26 }
 0x106   : > { %v752_v29 = vpop.f32.mrf.mxu1 }
 0x107   : > { %v1281_v32 = vadd.f32 %v1280_v25, %v1250_v27  ;;  %v1320_v33 = vmul.f32 %v1250_v27, %v1250_v27  ;;  %v753_v34 = vadd.f32 %v752_v29, %v428_v49  ;;  %v1253_v35 = vadd.f32 %v1875_v24, %v758_v28  ;;  %v1878_v37 = vpop.f32.mrf.mxu0 }
 0x108   : > { %v1828_v36 = vpop.f32.mrf.mxu1 }
 0x109   : > { %v1351_v39 = vadd.f32 %v1350_v31, %v1320_v33  ;;  %v1252_v41 = vadd.f32 %v1109_v30, %v753_v34  ;;  %v1282_v43 = vadd.f32 %v1281_v32, %v1251_v26  ;;  %v768_v45 = vadd.f32 %v1828_v36, %v1778_v51  ;;  %v1119_v8 = vpop.f32.mrf.mxu0 }
 0x10a   : > { %v762_v7 = vpop.f32.mrf.mxu1  ;;  %v1323_v12 = vmul.f32 %v1253_v35, %v1253_v35 }
 0x10b   : > { %v1283_v9 = vadd.f32 %v1282_v43, %v1252_v41  ;;  %v1322_v10 = vmul.f32 %v1252_v41, %v1252_v41  ;;  %v1352_v11 = vadd.f32 %v1351_v39, %v1321_v38  ;;  %v763_v47 = vadd.f32 %v762_v7, %v438_v53  ;;  %v1881_v15 = vpop.f32.mrf.mxu0 }
 0x10c   : > { %v1255_v13 = vadd.f32 %v1878_v37, %v768_v45  ;;  %v1831_v14 = vpop.f32.mrf.mxu1 }
 0x10d   : > { %v1353_v16 = vadd.f32 %v1352_v11, %v1322_v10  ;;  %v1254_v49 = vadd.f32 %v1119_v8, %v763_v47  ;;  %v1284_v17 = vadd.f32 %v1283_v9, %v1253_v35  ;;  %v778_v18 = vadd.f32 %v1831_v14, %v2395_v55  ;;  %v1129_v20 = vpop.f32.mrf.mxu0 }
 0x10e   : > { %v772_v19 = vpop.f32.mrf.mxu1  ;;  %v1325_v26 = vmul.f32 %v1255_v13, %v1255_v13 }
 0x10f   : > { %v1285_v21 = vadd.f32 %v1284_v17, %v1254_v49  ;;  %v1324_v22 = vmul.f32 %v1254_v49, %v1254_v49  ;;  %v1354_v51 = vadd.f32 %v1353_v16, %v1323_v12  ;;  %v773_v23 = vadd.f32 %v772_v19, %v2399_v57  ;;  %v1884_v25 = vpop.f32.mrf.mxu0 }
 0x110   : > { %v1834_v24 = vpop.f32.mrf.mxu1  ;;  %v1257_v27 = vadd.f32 %v1881_v15, %v778_v18 }
 0x111   : > { %v1355_v53 = vadd.f32 %v1354_v51, %v1324_v22  ;;  %v1286_v28 = vadd.f32 %v1285_v21, %v1255_v13  ;;  %v1256_v29 = vadd.f32 %v1129_v20, %v773_v23  ;;  %v788_v30 = vadd.f32 %v1834_v24, %v2403_v59  ;;  %v1139_v32 = vpop.f32.mrf.mxu0 }
 0x112   : > { %v782_v31 = vpop.f32.mrf.mxu1  ;;  %v1327_v38 = vmul.f32 %v1257_v27, %v1257_v27 }
 0x113   : > { %v1356_v33 = vadd.f32 %v1355_v53, %v1325_v26  ;;  %v783_v55 = vadd.f32 %v782_v31, %v2407_v61  ;;  %v1287_v34 = vadd.f32 %v1286_v28, %v1256_v29  ;;  %v1326_v35 = vmul.f32 %v1256_v29, %v1256_v29  ;;  %v1887_v37 = vpop.f32.mrf.mxu0 }
 0x114   : > { %v1837_v36 = vpop.f32.mrf.mxu1  ;;  %v1259_v41 = vadd.f32 %v1884_v25, %v788_v30 }
 0x115   : > { %v1258_v57 = vadd.f32 %v1139_v32, %v783_v55  ;;  %v1357_v39 = vadd.f32 %v1356_v33, %v1326_v35  ;;  %v1288_v43 = vadd.f32 %v1287_v34, %v1257_v27  ;;  %v798_v45 = vadd.f32 %v1837_v36, %v2411_v63  ;;  %v1149_v8 = vpop.f32.mrf.mxu0 }
 0x116   : > { %v792_v7 = vpop.f32.mrf.mxu1  ;;  %v1329_v14 = vmul.f32 %v1259_v41, %v1259_v41 }
 0x117   : > { %v1328_v9 = vmul.f32 %v1258_v57, %v1258_v57  ;;  %v793_v59 = vadd.f32 %v792_v7, %v2415_v1  ;;  %v1289_v10 = vadd.f32 %v1288_v43, %v1258_v57  ;;  %v1358_v11 = vadd.f32 %v1357_v39, %v1327_v38  ;;  %v1890_v61 = vpop.f32.mrf.mxu0 }
 0x118   : > { %v1840_v47 = vpop.f32.mrf.mxu1  ;;  %v1261_v16 = vadd.f32 %v1887_v37, %v798_v45 }
 0x119   : > { %v1260_v12 = vadd.f32 %v1149_v8, %v793_v59  ;;  %v808_v13 = vadd.f32 %v1840_v47, %v2419_v3  ;;  %v1359_v15 = vadd.f32 %v1358_v11, %v1328_v9  ;;  %v1290_v49 = vadd.f32 %v1289_v10, %v1259_v41  ;;  %v1159_v18 = vpop.f32.mrf.mxu0 }
 0x11a   : > { %v802_v17 = vpop.f32.mrf.mxu1  ;;  %v1331_v24 = vmul.f32 %v1261_v16, %v1261_v16 }
 0x11b   : > { %v1330_v19 = vmul.f32 %v1260_v12, %v1260_v12  ;;  %v803_v63 = vadd.f32 %v802_v17, %v2423_v5  ;;  %v1291_v20 = vadd.f32 %v1290_v49, %v1260_v12  ;;  %v1360_v21 = vadd.f32 %v1359_v15, %v1329_v14  ;;  %v1893_v1 = vpop.f32.mrf.mxu0 }
 0x11c   : > { %v1843_v22 = vpop.f32.mrf.mxu1  ;;  %v1263_v51 = vadd.f32 %v1890_v61, %v808_v13 }
 0x11d   : > { %v1262_v23 = vadd.f32 %v1159_v18, %v803_v63  ;;  %v1361_v25 = vadd.f32 %v1360_v21, %v1330_v19  ;;  %v1292_v26 = vadd.f32 %v1291_v20, %v1261_v16  ;;  %v818_v3 = vadd.f32 %v1843_v22, %v2379_v40  ;;  %v1169_v27 = vpop.f32.mrf.mxu0 }
 0x11e   : > { %v812_v53 = vpop.f32.mrf.mxu1  ;;  %v1333_v33 = vmul.f32 %v1263_v51, %v1263_v51 }
 0x11f   : > { %v1332_v28 = vmul.f32 %v1262_v23, %v1262_v23  ;;  %v813_v29 = vadd.f32 %v812_v53, %v2381_v42  ;;  %v1293_v30 = vadd.f32 %v1292_v26, %v1262_v23  ;;  %v1362_v31 = vadd.f32 %v1361_v25, %v1331_v24  ;;  %v1896_v5 = vpop.f32.mrf.mxu0 }
 0x120   : > { %v1846_v32 = vpop.f32.mrf.mxu1  ;;  %v1265_v35 = vadd.f32 %v1893_v1, %v818_v3 }
 0x121   : > { %v1264_v55 = vadd.f32 %v1169_v27, %v813_v29  ;;  %v1363_v34 = vadd.f32 %v1362_v31, %v1332_v28  ;;  %v1294_v36 = vadd.f32 %v1293_v30, %v1263_v51  ;;  %v828_v37 = vadd.f32 %v1846_v32, %v2383_v44  ;;  %v1179_v57 = vpop.f32.mrf.mxu0 }
 0x122   : > { %v822_v38 = vpop.f32.mrf.mxu1  ;;  %v1335_v9 = vmul.f32 %v1265_v35, %v1265_v35 }
 0x123   : > { %v1334_v39 = vmul.f32 %v1264_v55, %v1264_v55  ;;  %v823_v40 = vadd.f32 %v822_v38, %v2385_v46  ;;  %v1295_v41 = vadd.f32 %v1294_v36, %v1264_v55  ;;  %v1364_v43 = vadd.f32 %v1363_v34, %v1333_v33  ;;  %v1899_v42 = vpop.f32.mrf.mxu0 }
 0x124   : > { %v1849_v45 = vpop.f32.mrf.mxu1  ;;  %v1267_v10 = vadd.f32 %v1896_v5, %v828_v37 }
 0x125   : > { %v1266_v7 = vadd.f32 %v1179_v57, %v823_v40  ;;  %v838_v8 = vadd.f32 %v1849_v45, %v2387_v48  ;;  %v1365_v59 = vadd.f32 %v1364_v43, %v1334_v39  ;;  %v1296_v11 = vadd.f32 %v1295_v41, %v1265_v35  ;;  %v1189_v61 = vpop.f32.mrf.mxu0 }
 0x126   : > { %v832_v47 = vpop.f32.mrf.mxu1  ;;  %v1337_v17 = vmul.f32 %v1267_v10, %v1267_v10 }
 0x127   : > { %v1336_v12 = vmul.f32 %v1266_v7, %v1266_v7  ;;  %v833_v44 = vadd.f32 %v832_v47, %v2389_v50  ;;  %v1297_v13 = vadd.f32 %v1296_v11, %v1266_v7  ;;  %v1366_v14 = vadd.f32 %v1365_v59, %v1335_v9  ;;  %v1902_v46 = vpop.f32.mrf.mxu0 }
 0x128   : > { %v1852_v15 = vpop.f32.mrf.mxu1  ;;  %v1269_v16 = vadd.f32 %v1899_v42, %v838_v8 }
 0x129   : > { %v1268_v49 = vadd.f32 %v1189_v61, %v833_v44  ;;  %v1367_v18 = vadd.f32 %v1366_v14, %v1336_v12  ;;  %v1298_v19 = vadd.f32 %v1297_v13, %v1267_v10  ;;  %v848_v48 = vadd.f32 %v1852_v15, %v2391_v52  ;;  %v1199_v20 = vpop.f32.mrf.mxu0 }
 0x12a   : > { %v842_v63 = vpop.f32.mrf.mxu1  ;;  %v1339_v24 = vmul.f32 %v1269_v16, %v1269_v16 }
 0x12b   : > { %v1338_v21 = vmul.f32 %v1268_v49, %v1268_v49  ;;  %v843_v22 = vadd.f32 %v842_v63, %v2393_v54  ;;  %v1299_v1 = vadd.f32 %v1298_v19, %v1268_v49  ;;  %v1368_v51 = vadd.f32 %v1367_v18, %v1337_v17  ;;  %v1905_v50 = vpop.f32.mrf.mxu0 }
 0x12c   : > { %v1855_v23 = vpop.f32.mrf.mxu1  ;;  %v1271_v3 = vadd.f32 %v1902_v46, %v848_v48 }
 0x12d   : > { %v1270_v25 = vadd.f32 %v1199_v20, %v843_v22  ;;  %v1369_v26 = vadd.f32 %v1368_v51, %v1338_v21  ;;  %v1300_v53 = vadd.f32 %v1299_v1, %v1269_v16  ;;  %v858_v27 = vadd.f32 %v1855_v23, %v2397_v56  ;;  %v1209_v29 = vpop.f32.mrf.mxu0 }
 0x12e   : > { %v852_v28 = vpop.f32.mrf.mxu1  ;;  %v1341_v34 = vmul.f32 %v1271_v3, %v1271_v3 }
 0x12f   : > { %v1340_v30 = vmul.f32 %v1270_v25, %v1270_v25  ;;  %v853_v52 = vadd.f32 %v852_v28, %v2401_v58  ;;  %v1301_v31 = vadd.f32 %v1300_v53, %v1270_v25  ;;  %v1370_v32 = vadd.f32 %v1369_v26, %v1339_v24  ;;  %v1908_v54 = vpop.f32.mrf.mxu0 }
 0x130   : > { %v1858_v5 = vpop.f32.mrf.mxu1  ;;  %v1273_v36 = vadd.f32 %v1905_v50, %v858_v27 }
 0x131   : > { %v1272_v33 = vadd.f32 %v1209_v29, %v853_v52  ;;  %v868_v55 = vadd.f32 %v1858_v5, %v2405_v60  ;;  %v1371_v35 = vadd.f32 %v1370_v32, %v1340_v30  ;;  %v1302_v37 = vadd.f32 %v1301_v31, %v1271_v3  ;;  %v1219_v57 = vpop.f32.mrf.mxu0 }
 0x132   : > { %v862_v38 = vpop.f32.mrf.mxu1  ;;  %v1343_v7 = vmul.f32 %v1273_v36, %v1273_v36 }
 0x133   : > { %v1342_v39 = vmul.f32 %v1272_v33, %v1272_v33  ;;  %v863_v56 = vadd.f32 %v862_v38, %v2409_v62  ;;  %v1303_v40 = vadd.f32 %v1302_v37, %v1272_v33  ;;  %v1372_v41 = vadd.f32 %v1371_v35, %v1341_v34  ;;  %v1911_v58 = vpop.f32.mrf.mxu0 }
 0x134   : > { %v1861_v43 = vpop.f32.mrf.mxu1  ;;  %v1275_v45 = vadd.f32 %v1908_v54, %v868_v55 }
 0x135   : > { %v1274_v42 = vadd.f32 %v1219_v57, %v863_v56  ;;  %v1373_v8 = vadd.f32 %v1372_v41, %v1342_v39  ;;  %v1304_v9 = vadd.f32 %v1303_v40, %v1273_v36  ;;  %v878_v60 = vadd.f32 %v1861_v43, %v2413_v0  ;;  %v1229_v10 = vpop.f32.mrf.mxu0 }
 0x136   : > { %v872_v59 = vpop.f32.mrf.mxu1  ;;  %v1345_v13 = vmul.f32 %v1275_v45, %v1275_v45 }
 0x137   : > { %v1344_v11 = vmul.f32 %v1274_v42, %v1274_v42  ;;  %v873_v47 = vadd.f32 %v872_v59, %v2417_v2  ;;  %v1305_v61 = vadd.f32 %v1304_v9, %v1274_v42  ;;  %v1374_v12 = vadd.f32 %v1373_v8, %v1343_v7  ;;  %v1914_v62 = vpop.f32.mrf.mxu0 }
 0x138   : > { %v1864_v44 = vpop.f32.mrf.mxu1  ;;  %v1277_v46 = vadd.f32 %v1911_v58, %v878_v60 }
 0x139   : > { %v1276_v14 = vadd.f32 %v1229_v10, %v873_v47  ;;  %v1375_v15 = vadd.f32 %v1374_v12, %v1344_v11  ;;  %v1306_v16 = vadd.f32 %v1305_v61, %v1275_v45  ;;  %v888_v49 = vadd.f32 %v1864_v44, %v2421_v4  ;;  %v1239_v63 = vpop.f32.mrf.mxu0 }
 0x13a   : > { %v882_v17 = vpop.f32.mrf.mxu1  ;;  %v1347_v20 = vmul.f32 %v1277_v46, %v1277_v46 }
 0x13b   : > { %v1346_v18 = vmul.f32 %v1276_v14, %v1276_v14  ;;  %v883_v0 = vadd.f32 %v882_v17, %v2425_v6  ;;  %v1307_v19 = vadd.f32 %v1306_v16, %v1276_v14  ;;  %v1376_v48 = vadd.f32 %v1375_v15, %v1345_v13 }
 0x13c   : > { %v1279_v22 = vadd.f32 %v1914_v62, %v888_v49 }
 0x13d   : > { %v1278_v2 = vadd.f32 %v1239_v63, %v883_v0  ;;  %v1377_v21 = vadd.f32 %v1376_v48, %v1346_v18  ;;  %v1308_v1 = vadd.f32 %v1307_v19, %v1277_v46 }
 0x13e   : > { %v1349_v24 = vmul.f32 %v1279_v22, %v1279_v22 }
 0x13f   : > { %v1348_v51 = vmul.f32 %v1278_v2, %v1278_v2  ;;  %v1309_v23 = vadd.f32 %v1308_v1, %v1278_v2  ;;  %v1378_v50 = vadd.f32 %v1377_v21, %v1347_v20 }
 0x141   : > { %v1310_v25 = vadd.f32 %v1309_v23, %v1279_v22  ;;  %v1379_v4 = vadd.f32 %v1378_v50, %v1348_v51 }
 0x143   : > { %v1311_v26 = vrot.slane %v1310_v25, 4  ;;  %v1380_v3 = vadd.f32 %v1379_v4, %v1349_v24 }
 0x145   : > { %v1312_v53 = vadd.f32 %v1311_v26, %v1310_v25  ;;  %v1381_v6 = vrot.slane %v1380_v3, 4 }
 0x147   : > { %v1313_v27 = vrot.slane %v1312_v53, 2  ;;  %v1382_v28 = vadd.f32 %v1381_v6, %v1380_v3 }
 0x149   : > { %v1314_v29 = vadd.f32 %v1313_v27, %v1312_v53  ;;  %v1383_v30 = vrot.slane %v1382_v28, 2 }
 0x14b   : > { %v1315_v52 = vrot.slane %v1314_v29, 1  ;;  %v1384_v31 = vadd.f32 %v1383_v30, %v1382_v28 }
 0x14d   : > { %v1385_v32 = vrot.slane %v1384_v31, 1  ;;  %v1316_v5 = vadd.f32 %v1315_v52, %v1314_v29 }
 0x14f   : > { %v1386_v54 = vadd.f32 %v1385_v32, %v1384_v31 }
 0x151   : > { %v1389_v33 = vsel %vm1388_vm2, %v1316_v5, %v1386_v54 }
 0x152   : > { %v1391_v55 = vsel %vm1390_vm3, %v1389_v33, 0.0 }
 0x153   : > { %1392 = vst [vmem:[%s163_s15] sm:$0xff] %v1391_v55 }
 0x154   : > { %1986 = shalt.err (!%p1983_p5)
}
 0x155   : > { %s1987_s28 = scalar_lea.hbm %s2456_s23, 128  ;;  %s1991_s3 = scalar_lea.hbm %s2498_s2, 256 }
 0x156   : > { %p1988_p6 = scmp.ne.s32.totalorder %s2456_s23, %s1987_s28  ;;  %p1992_p10 = scmp.lt.s32.totalorder %s2456_s23, %s2498_s2 }
 0x157   : > { %p1993_p11 = scmp.lt.s32.totalorder %s1991_s3, %s1987_s28 }
 0x158   : > { %p1989_p7 = pnand %p1988_p6, %p2107_p4 }
 0x159   : > { %p1994_p12 = por %p1993_p11, %p1992_p10 }
 0x15a   : > { %p1990_p9 = pneg %p1989_p7 }
 0x15c   : > { %p1995_p13 = pnand %p1994_p12, %p1990_p9 }
 0x15e   : > { %1998 = shalt.err (!%p1995_p13)
}
 0x15f   : > { %1918 = dma.vmem_to_hbm [thread:$0]  (%p2107_p4), %s1409_s16, 128, %s2456_s23, %s1394_s24  }
 0x160 PF: > { %p1924_p0 = scmp.ge.s32.totalorder %s2049_s14, 2  ;;  %s1420_s6 = sand.u32 1, %s2029_s9  }
 0x161   : > { %s1421_s7 = scalar_lea.sflag [#allocation3], %s1420_s6 }
 0x162   : > { %p1921_p1 = pnand %p1924_p0, %p2114_p8 }
 0x164   : > { %p1922_p2 = pneg %p1921_p1 }
 0x166   : > { %2024 = dma.done.wait (%p1922_p2), %s1421_s7, 128  }
 0x167   : > { %2026 = vsyncadd (%p1922_p2), %s1421_s7, 4294967168  ;;  %s15_s14 = sadd.s32 1, %s2049_s14   ;;  %s2501_s9 = smov %s2033_s10 }
 0x168   : > { %p12_p3 = scmp.ge.s32.totalorder %s15_s14, 4   ;;  %s2502_s10 = smov %s2037_s11 }
 0x169   : > { %s2503_s11 = smov %s2120_s22  ;;  %s2504_s12 = smov %s2045_s13 }
 0x16a   : > { %s2505_s13 = smov %s2507_s17  ;;  %14 = sbr.rel (!%p12_p3) target bundleno = 4 (0x4), region = 68 }
 0x16f   :  { %1426 = vsyncpa [#allocation3], 1 }
 0x170   :  { %1428 = vsyncpa [#allocation3 + $0x1], 1 }

</bundles_post_ra>
